<compile_context>
chip_gen: v5e
topology: v5e:2x2
jax: 0.10.0
libtpu: 0.0.40
codegen_flags: <defaults>
</compile_context>

<pallas_src>
import jax
import jax.numpy as jnp
import numpy as np
from jax.experimental import pallas as pl
from jax.experimental.pallas import tpu as pltpu


# ----------------------------- hyper-params (consistent with the module) -----
EMBEDDING_DIM = 8
INPUT_SIZE = 11                       # 11 categorical features
LAYER1_SIZE = 64
LAYER2_SIZE = 32
LAYER3_SIZE = 16
OUTPUT_HOUR_SIZE = 24
OUTPUT_DAY_SIZE = 8
OUT_PAD = 128                         # lane-dense padded output width
BATCH = 8
BN_EPS = 1e-5

# per-feature vocabulary sizes (payed_time fixed at 24 by the module)
VOCAB_SIZES = [24, 5, 6, 50, 10, 12, 14, 30, 40, 16, 64]
TOTAL_VOCAB = int(np.sum(VOCAB_SIZES))          # 271
VOCAB_PAD = 384                                 # 3 * 128 lanes (padded rows are zero)


# ----------------------------------------------------------------- kernel ----
def fused_network_kernel(x_ref, off_ref,
                         t1_ref, b1_ref,
                         w2_ref, b2_ref,
                         w3_ref, b3_ref,
                         w4_ref, b4_ref,
                         o_ref):
    """Embedding-gather (as multi-hot MXU matmul) + both FC heads, fully fused."""
    B = x_ref.shape[0]
    # flat row index into the stacked (layer-1-folded) embedding table
    flat = x_ref[...] + off_ref[...]                                   # [B, 11] i32
    cols = jax.lax.broadcasted_iota(jnp.int32, (B, VOCAB_PAD), 1)      # [B, 384]
    # multi-hot selection matrix: features occupy disjoint row ranges, so the
    # sum of 11 one-hots is exact.
    m = jnp.zeros((B, VOCAB_PAD), jnp.float32)
    for f in range(INPUT_SIZE):
        m = m + (cols == flat[:, f][:, None]).astype(jnp.float32)
    # layer 1 (embedding + Linear + folded BN) -> ReLU
    h = jnp.dot(m, t1_ref[...], preferred_element_type=jnp.float32) + b1_ref[...]
    h = jnp.maximum(h, 0.0)
    # layers 2-3: (Linear + folded BN + ReLU), block-diag over the two heads
    h = jnp.maximum(
        jnp.dot(h, w2_ref[...], preferred_element_type=jnp.float32) + b2_ref[...], 0.0)
    h = jnp.maximum(
        jnp.dot(h, w3_ref[...], preferred_element_type=jnp.float32) + b3_ref[...], 0.0)
    # layer 4: Linear, padded to a lane-dense 128-wide output slab
    o_ref[...] = (jnp.dot(h, w4_ref[...], preferred_element_type=jnp.float32)
                  + b4_ref[...])


def _full_spec(shape):
    # full-array block (block_shape == array shape), single grid step
    return pl.BlockSpec(shape, lambda i, _nd=len(shape): (0,) * _nd)


def fused_forward_padded(x, fp):
    """One pallas_call computing the whole model; returns padded [B, 128] slab."""
    B = x.shape[0]
    args = (x, fp["offsets"], fp["t1"], fp["b1"], fp["w2"], fp["b2"],
            fp["w3"], fp["b3"], fp["w4"], fp["b4"])
    return pl.pallas_call(
        fused_network_kernel,
        out_shape=jax.ShapeDtypeStruct((B, OUT_PAD), jnp.float32),
        grid=(1,),
        in_specs=[_full_spec(a.shape) for a in args],
        out_specs=pl.BlockSpec((B, OUT_PAD), lambda i: (0, 0)),
        compiler_params=pltpu.CompilerParams(
            dimension_semantics=("arbitrary",)),
    )(*args)


# -------------------------------------------------------------- parameters ---
def make_raw_params(key):
    """Raw (un-folded) params mimicking the PyTorch module in eval mode.

    Non-trivial BN running stats / affine params so the fold is actually
    exercised (default init stats would make the fold a no-op).
    """
    n_keys = len(VOCAB_SIZES) + 2
    keys = jax.random.split(key, n_keys)
    emb = [jax.random.normal(keys[i], (VOCAB_SIZES[i], EMBEDDING_DIM), jnp.float32)
           for i in range(len(VOCAB_SIZES))]

    def make_head(hkey, out_dim):
        dims = [INPUT_SIZE * EMBEDDING_DIM, LAYER1_SIZE, LAYER2_SIZE, LAYER3_SIZE, out_dim]
        ks = jax.random.split(hkey, 24)
        layers = []
        ki = 0
        for li in range(4):
            d_in, d_out = dims[li], dims[li + 1]
            w = jax.random.normal(ks[ki], (d_in, d_out), jnp.float32) * 0.05; ki += 1
            b = jax.random.normal(ks[ki], (d_out,), jnp.float32) * 0.05; ki += 1
            if li < 3:
                gamma = 0.5 + jax.random.uniform(ks[ki], (d_out,), jnp.float32); ki += 1
                beta = jax.random.normal(ks[ki], (d_out,), jnp.float32) * 0.1; ki += 1
                rmean = jax.random.normal(ks[ki], (d_out,), jnp.float32) * 0.1; ki += 1
                rvar = 0.5 + jax.random.uniform(ks[ki], (d_out,), jnp.float32); ki += 1
                layers.append((w, b, gamma, beta, rmean, rvar))
            else:
                layers.append((w, b))
        return layers

    hour = make_head(keys[-2], OUTPUT_HOUR_SIZE)
    day = make_head(keys[-1], OUTPUT_DAY_SIZE)
    return {"emb": emb, "hour": hour, "day": day}


def _fold_bn(w, b, gamma, beta, rmean, rvar, eps=BN_EPS):
    """y = BN(x @ w + b)  ==  x @ (w*s) + ((b - rmean)*s + beta),  s = gamma/sqrt(var+eps)."""
    s = gamma / jnp.sqrt(rvar + eps)
    return w * s[None, :], (b - rmean) * s + beta


def _block_diag(a, b):
    top = jnp.concatenate([a, jnp.zeros((a.shape[0], b.shape[1]), a.dtype)], axis=1)
    bot = jnp.concatenate([jnp.zeros((b.shape[0], a.shape[1]), b.dtype), b], axis=1)
    return jnp.concatenate([top, bot], axis=0)


def prep_forward_params(raw):
    """Fold BN, fuse the two heads (block-diag), fold embeddings through layer 1."""
    def folded_layers(head):
        out = []
        for li in range(3):
            w, b, g, be, rm, rv = head[li]
            out.append(_fold_bn(w, b, g, be, rm, rv))
        out.append(head[3])
        return out

    h = folded_layers(raw["hour"])
    d = folded_layers(raw["day"])

    # layer 1: same input for both heads -> concatenate output columns
    w1 = jnp.concatenate([h[0][0], d[0][0]], axis=1)                   # [88, 128]
    b1 = jnp.concatenate([h[0][1], d[0][1]])[None, :]                  # [1, 128]

    # fold each embedding table through its 8-wide slice of w1 -> stacked table
    rows = [raw["emb"][f] @ w1[EMBEDDING_DIM * f: EMBEDDING_DIM * (f + 1), :]
            for f in range(INPUT_SIZE)]
    t1 = jnp.concatenate(rows, axis=0)                                 # [271, 128]
    t1 = jnp.pad(t1, ((0, VOCAB_PAD - TOTAL_VOCAB), (0, 0)))           # [384, 128]

    # per-feature row offsets into the stacked table
    offsets = jnp.array(np.cumsum([0] + VOCAB_SIZES[:-1]),
                        jnp.int32)[None, :]                            # [1, 11]

    # layers 2-3: block-diagonal (heads stay independent)
    w2 = _block_diag(h[1][0], d[1][0])                                 # [128, 64]
    b2 = jnp.concatenate([h[1][1], d[1][1]])[None, :]                  # [1, 64]
    w3 = _block_diag(h[2][0], d[2][0])                                 # [64, 32]
    b3 = jnp.concatenate([h[2][1], d[2][1]])[None, :]                  # [1, 32]
    # layer 4: block-diagonal, padded to a lane-dense 128-wide output
    w4 = _block_diag(h[3][0], d[3][0])                                 # [32, 32]
    b4 = jnp.concatenate([h[3][1], d[3][1]])                           # [32]
    pad = OUT_PAD - (OUTPUT_HOUR_SIZE + OUTPUT_DAY_SIZE)
    w4 = jnp.pad(w4, ((0, 0), (0, pad)))                               # [32, 128]
    b4 = jnp.pad(b4, (0, pad))[None, :]                                # [1, 128]

    return {"offsets": offsets, "t1": t1, "b1": b1,
            "w2": w2, "b2": b2, "w3": w3, "b3": b3, "w4": w4, "b4": b4}


# ----------------------------------------------------------------- forward ---
@jax.jit
def network_forward(x, fp):
    out = fused_forward_padded(x, fp)                                  # [B, 128]
    out_hour = out[:, :OUTPUT_HOUR_SIZE]
    out_day = out[:, OUTPUT_HOUR_SIZE:OUTPUT_HOUR_SIZE + OUTPUT_DAY_SIZE]
    return out_hour, out_day


# -------------------------------------------------- pure-JAX reference -------
def reference_forward(x, raw):
    embs = [jnp.take(raw["emb"][k], x[:, k], axis=0) for k in range(INPUT_SIZE)]
    x_cat = jnp.concatenate(embs, axis=1)

    def head(layers):
        h = x_cat
        for li in range(3):
            w, b, g, be, rm, rv = layers[li]
            h = h @ w + b
            h = (h - rm) / jnp.sqrt(rv + BN_EPS) * g + be
            h = jnp.maximum(h, 0.0)
        w, b = layers[3]
        return h @ w + b

    return head(raw["hour"]), head(raw["day"])


# -------------------------------------------------------------------- main ---
if __name__ == "__main__":
    root = jax.random.PRNGKey(0)
    pkey, xkey = jax.random.split(root)
    raw_params = make_raw_params(pkey)
    fwd_params = prep_forward_params(raw_params)

    # x: [B, 11] int32 categorical indices, each column within its vocab range
    xkeys = jax.random.split(xkey, INPUT_SIZE)
    cols = [jax.random.randint(xkeys[k], (BATCH, 1), 0, VOCAB_SIZES[k], dtype=jnp.int32)
            for k in range(INPUT_SIZE)]
    x = jnp.concatenate(cols, axis=1)

    out_hour, out_day = network_forward(x, fwd_params)
    jax.block_until_ready((out_hour, out_day))

    assert out_hour.shape == (BATCH, OUTPUT_HOUR_SIZE)
    assert out_day.shape == (BATCH, OUTPUT_DAY_SIZE)

    ref_hour, ref_day = reference_forward(x, raw_params)
    np.testing.assert_allclose(np.asarray(out_hour), np.asarray(ref_hour),
                               rtol=1e-2, atol=1e-2)
    np.testing.assert_allclose(np.asarray(out_day), np.asarray(ref_day),
                               rtol=1e-2, atol=1e-2)

    print("KERNEL_OK")
</pallas_src>

<mosaic_0001>
module attributes {stable_mosaic.version = 11 : i64} {
  func.func @fused_network_kernel(%arg0: i32, %arg1: memref<8x11xi32, #tpu.memory_space<vmem>>, %arg2: memref<1x11xi32, #tpu.memory_space<vmem>>, %arg3: memref<384x128xf32, #tpu.memory_space<vmem>>, %arg4: memref<1x128xf32, #tpu.memory_space<vmem>>, %arg5: memref<128x64xf32, #tpu.memory_space<vmem>>, %arg6: memref<1x64xf32, #tpu.memory_space<vmem>>, %arg7: memref<64x32xf32, #tpu.memory_space<vmem>>, %arg8: memref<1x32xf32, #tpu.memory_space<vmem>>, %arg9: memref<32x128xf32, #tpu.memory_space<vmem>>, %arg10: memref<1x128xf32, #tpu.memory_space<vmem>>, %arg11: memref<8x128xf32, #tpu.memory_space<vmem>>) attributes {dimension_semantics = [#tpu.dimension_semantics<arbitrary>], iteration_bounds = array<i64: 1>, scalar_prefetch = 0 : i64, scratch_operands = 0 : i64, tpu.core_type = #tpu.core_type<tc>, window_params = [{pipeline_mode = #tpu.pipeline_mode<synchronous>, transform_indices = @transform_0, window_bounds = array<i64: 8, 11>}, {pipeline_mode = #tpu.pipeline_mode<synchronous>, transform_indices = @transform_1, window_bounds = array<i64: 1, 11>}, {pipeline_mode = #tpu.pipeline_mode<synchronous>, transform_indices = @transform_2, window_bounds = array<i64: 384, 128>}, {pipeline_mode = #tpu.pipeline_mode<synchronous>, transform_indices = @transform_3, window_bounds = array<i64: 1, 128>}, {pipeline_mode = #tpu.pipeline_mode<synchronous>, transform_indices = @transform_4, window_bounds = array<i64: 128, 64>}, {pipeline_mode = #tpu.pipeline_mode<synchronous>, transform_indices = @transform_5, window_bounds = array<i64: 1, 64>}, {pipeline_mode = #tpu.pipeline_mode<synchronous>, transform_indices = @transform_6, window_bounds = array<i64: 64, 32>}, {pipeline_mode = #tpu.pipeline_mode<synchronous>, transform_indices = @transform_7, window_bounds = array<i64: 1, 32>}, {pipeline_mode = #tpu.pipeline_mode<synchronous>, transform_indices = @transform_8, window_bounds = array<i64: 32, 128>}, {pipeline_mode = #tpu.pipeline_mode<synchronous>, transform_indices = @transform_9, window_bounds = array<i64: 1, 128>}, {pipeline_mode = #tpu.pipeline_mode<synchronous>, transform_indices = @transform_10, window_bounds = array<i64: 8, 128>}]} {
    %c0 = arith.constant 0 : index
    %c0_0 = arith.constant 0 : index
    %0 = vector.load %arg1[%c0, %c0_0] : memref<8x11xi32, #tpu.memory_space<vmem>>, vector<8x11xi32>
    %c0_1 = arith.constant 0 : index
    %c0_2 = arith.constant 0 : index
    %1 = vector.load %arg2[%c0_1, %c0_2] : memref<1x11xi32, #tpu.memory_space<vmem>>, vector<1x11xi32>
    %2 = vector.broadcast %1 : vector<1x11xi32> to vector<8x11xi32>
    %3 = arith.addi %0, %2 : vector<8x11xi32>
    %4 = tpu.iota {dimensions = array<i32: 1>} : vector<8x384xi32>
    %cst = arith.constant 0.000000e+00 : f32
    %5 = vector.broadcast %cst : f32 to vector<8x384xf32>
    %6 = vector.extract_strided_slice %3 {offsets = [0, 0], sizes = [8, 1], strides = [1, 1]} : vector<8x11xi32> to vector<8x1xi32>
    %7 = vector.shape_cast %6 : vector<8x1xi32> to vector<8xi32>
    %8 = vector.shape_cast %7 : vector<8xi32> to vector<8x1xi32>
    %9 = vector.broadcast %8 : vector<8x1xi32> to vector<8x384xi32>
    %10 = arith.cmpi eq, %4, %9 : vector<8x384xi32>
    %11 = arith.extui %10 : vector<8x384xi1> to vector<8x384xi32>
    %12 = arith.sitofp %11 : vector<8x384xi32> to vector<8x384xf32>
    %13 = arith.addf %5, %12 : vector<8x384xf32>
    %14 = vector.extract_strided_slice %3 {offsets = [0, 1], sizes = [8, 1], strides = [1, 1]} : vector<8x11xi32> to vector<8x1xi32>
    %15 = vector.shape_cast %14 : vector<8x1xi32> to vector<8xi32>
    %16 = vector.shape_cast %15 : vector<8xi32> to vector<8x1xi32>
    %17 = vector.broadcast %16 : vector<8x1xi32> to vector<8x384xi32>
    %18 = arith.cmpi eq, %4, %17 : vector<8x384xi32>
    %19 = arith.extui %18 : vector<8x384xi1> to vector<8x384xi32>
    %20 = arith.sitofp %19 : vector<8x384xi32> to vector<8x384xf32>
    %21 = arith.addf %13, %20 : vector<8x384xf32>
    %22 = vector.extract_strided_slice %3 {offsets = [0, 2], sizes = [8, 1], strides = [1, 1]} : vector<8x11xi32> to vector<8x1xi32>
    %23 = vector.shape_cast %22 : vector<8x1xi32> to vector<8xi32>
    %24 = vector.shape_cast %23 : vector<8xi32> to vector<8x1xi32>
    %25 = vector.broadcast %24 : vector<8x1xi32> to vector<8x384xi32>
    %26 = arith.cmpi eq, %4, %25 : vector<8x384xi32>
    %27 = arith.extui %26 : vector<8x384xi1> to vector<8x384xi32>
    %28 = arith.sitofp %27 : vector<8x384xi32> to vector<8x384xf32>
    %29 = arith.addf %21, %28 : vector<8x384xf32>
    %30 = vector.extract_strided_slice %3 {offsets = [0, 3], sizes = [8, 1], strides = [1, 1]} : vector<8x11xi32> to vector<8x1xi32>
    %31 = vector.shape_cast %30 : vector<8x1xi32> to vector<8xi32>
    %32 = vector.shape_cast %31 : vector<8xi32> to vector<8x1xi32>
    %33 = vector.broadcast %32 : vector<8x1xi32> to vector<8x384xi32>
    %34 = arith.cmpi eq, %4, %33 : vector<8x384xi32>
    %35 = arith.extui %34 : vector<8x384xi1> to vector<8x384xi32>
    %36 = arith.sitofp %35 : vector<8x384xi32> to vector<8x384xf32>
    %37 = arith.addf %29, %36 : vector<8x384xf32>
    %38 = vector.extract_strided_slice %3 {offsets = [0, 4], sizes = [8, 1], strides = [1, 1]} : vector<8x11xi32> to vector<8x1xi32>
    %39 = vector.shape_cast %38 : vector<8x1xi32> to vector<8xi32>
    %40 = vector.shape_cast %39 : vector<8xi32> to vector<8x1xi32>
    %41 = vector.broadcast %40 : vector<8x1xi32> to vector<8x384xi32>
    %42 = arith.cmpi eq, %4, %41 : vector<8x384xi32>
    %43 = arith.extui %42 : vector<8x384xi1> to vector<8x384xi32>
    %44 = arith.sitofp %43 : vector<8x384xi32> to vector<8x384xf32>
    %45 = arith.addf %37, %44 : vector<8x384xf32>
    %46 = vector.extract_strided_slice %3 {offsets = [0, 5], sizes = [8, 1], strides = [1, 1]} : vector<8x11xi32> to vector<8x1xi32>
    %47 = vector.shape_cast %46 : vector<8x1xi32> to vector<8xi32>
    %48 = vector.shape_cast %47 : vector<8xi32> to vector<8x1xi32>
    %49 = vector.broadcast %48 : vector<8x1xi32> to vector<8x384xi32>
    %50 = arith.cmpi eq, %4, %49 : vector<8x384xi32>
    %51 = arith.extui %50 : vector<8x384xi1> to vector<8x384xi32>
    %52 = arith.sitofp %51 : vector<8x384xi32> to vector<8x384xf32>
    %53 = arith.addf %45, %52 : vector<8x384xf32>
    %54 = vector.extract_strided_slice %3 {offsets = [0, 6], sizes = [8, 1], strides = [1, 1]} : vector<8x11xi32> to vector<8x1xi32>
    %55 = vector.shape_cast %54 : vector<8x1xi32> to vector<8xi32>
    %56 = vector.shape_cast %55 : vector<8xi32> to vector<8x1xi32>
    %57 = vector.broadcast %56 : vector<8x1xi32> to vector<8x384xi32>
    %58 = arith.cmpi eq, %4, %57 : vector<8x384xi32>
    %59 = arith.extui %58 : vector<8x384xi1> to vector<8x384xi32>
    %60 = arith.sitofp %59 : vector<8x384xi32> to vector<8x384xf32>
    %61 = arith.addf %53, %60 : vector<8x384xf32>
    %62 = vector.extract_strided_slice %3 {offsets = [0, 7], sizes = [8, 1], strides = [1, 1]} : vector<8x11xi32> to vector<8x1xi32>
    %63 = vector.shape_cast %62 : vector<8x1xi32> to vector<8xi32>
    %64 = vector.shape_cast %63 : vector<8xi32> to vector<8x1xi32>
    %65 = vector.broadcast %64 : vector<8x1xi32> to vector<8x384xi32>
    %66 = arith.cmpi eq, %4, %65 : vector<8x384xi32>
    %67 = arith.extui %66 : vector<8x384xi1> to vector<8x384xi32>
    %68 = arith.sitofp %67 : vector<8x384xi32> to vector<8x384xf32>
    %69 = arith.addf %61, %68 : vector<8x384xf32>
    %70 = vector.extract_strided_slice %3 {offsets = [0, 8], sizes = [8, 1], strides = [1, 1]} : vector<8x11xi32> to vector<8x1xi32>
    %71 = vector.shape_cast %70 : vector<8x1xi32> to vector<8xi32>
    %72 = vector.shape_cast %71 : vector<8xi32> to vector<8x1xi32>
    %73 = vector.broadcast %72 : vector<8x1xi32> to vector<8x384xi32>
    %74 = arith.cmpi eq, %4, %73 : vector<8x384xi32>
    %75 = arith.extui %74 : vector<8x384xi1> to vector<8x384xi32>
    %76 = arith.sitofp %75 : vector<8x384xi32> to vector<8x384xf32>
    %77 = arith.addf %69, %76 : vector<8x384xf32>
    %78 = vector.extract_strided_slice %3 {offsets = [0, 9], sizes = [8, 1], strides = [1, 1]} : vector<8x11xi32> to vector<8x1xi32>
    %79 = vector.shape_cast %78 : vector<8x1xi32> to vector<8xi32>
    %80 = vector.shape_cast %79 : vector<8xi32> to vector<8x1xi32>
    %81 = vector.broadcast %80 : vector<8x1xi32> to vector<8x384xi32>
    %82 = arith.cmpi eq, %4, %81 : vector<8x384xi32>
    %83 = arith.extui %82 : vector<8x384xi1> to vector<8x384xi32>
    %84 = arith.sitofp %83 : vector<8x384xi32> to vector<8x384xf32>
    %85 = arith.addf %77, %84 : vector<8x384xf32>
    %86 = vector.extract_strided_slice %3 {offsets = [0, 10], sizes = [8, 1], strides = [1, 1]} : vector<8x11xi32> to vector<8x1xi32>
    %87 = vector.shape_cast %86 : vector<8x1xi32> to vector<8xi32>
    %88 = vector.shape_cast %87 : vector<8xi32> to vector<8x1xi32>
    %89 = vector.broadcast %88 : vector<8x1xi32> to vector<8x384xi32>
    %90 = arith.cmpi eq, %4, %89 : vector<8x384xi32>
    %91 = arith.extui %90 : vector<8x384xi1> to vector<8x384xi32>
    %92 = arith.sitofp %91 : vector<8x384xi32> to vector<8x384xf32>
    %93 = arith.addf %85, %92 : vector<8x384xf32>
    %c0_3 = arith.constant 0 : index
    %c0_4 = arith.constant 0 : index
    %94 = vector.load %arg3[%c0_3, %c0_4] : memref<384x128xf32, #tpu.memory_space<vmem>>, vector<384x128xf32>
    %cst_5 = arith.constant dense<0.000000e+00> : vector<8x128xf32>
    %95 = tpu.matmul %93, %94, %cst_5 {dimension_numbers = #tpu.dot_dimension_numbers<[1], [0], [0], [1], [0, 0, 1, 1], [], []>} : vector<8x384xf32>, vector<384x128xf32>, vector<8x128xf32> -> vector<8x128xf32>
    %c0_6 = arith.constant 0 : index
    %c0_7 = arith.constant 0 : index
    %96 = vector.load %arg4[%c0_6, %c0_7] : memref<1x128xf32, #tpu.memory_space<vmem>>, vector<1x128xf32>
    %97 = vector.broadcast %96 : vector<1x128xf32> to vector<8x128xf32>
    %98 = arith.addf %95, %97 : vector<8x128xf32>
    %cst_8 = arith.constant 0.000000e+00 : f32
    %99 = vector.broadcast %cst_8 : f32 to vector<8x128xf32>
    %100 = arith.maximumf %98, %99 : vector<8x128xf32>
    %c0_9 = arith.constant 0 : index
    %c0_10 = arith.constant 0 : index
    %101 = vector.load %arg5[%c0_9, %c0_10] : memref<128x64xf32, #tpu.memory_space<vmem>>, vector<128x64xf32>
    %cst_11 = arith.constant dense<0.000000e+00> : vector<8x64xf32>
    %102 = tpu.matmul %100, %101, %cst_11 {dimension_numbers = #tpu.dot_dimension_numbers<[1], [0], [0], [1], [0, 0, 1, 1], [], []>} : vector<8x128xf32>, vector<128x64xf32>, vector<8x64xf32> -> vector<8x64xf32>
    %c0_12 = arith.constant 0 : index
    %c0_13 = arith.constant 0 : index
    %103 = vector.load %arg6[%c0_12, %c0_13] : memref<1x64xf32, #tpu.memory_space<vmem>>, vector<1x64xf32>
    %104 = vector.broadcast %103 : vector<1x64xf32> to vector<8x64xf32>
    %105 = arith.addf %102, %104 : vector<8x64xf32>
    %cst_14 = arith.constant 0.000000e+00 : f32
    %106 = vector.broadcast %cst_14 : f32 to vector<8x64xf32>
    %107 = arith.maximumf %105, %106 : vector<8x64xf32>
    %c0_15 = arith.constant 0 : index
    %c0_16 = arith.constant 0 : index
    %108 = vector.load %arg7[%c0_15, %c0_16] : memref<64x32xf32, #tpu.memory_space<vmem>>, vector<64x32xf32>
    %cst_17 = arith.constant dense<0.000000e+00> : vector<8x32xf32>
    %109 = tpu.matmul %107, %108, %cst_17 {dimension_numbers = #tpu.dot_dimension_numbers<[1], [0], [0], [1], [0, 0, 1, 1], [], []>} : vector<8x64xf32>, vector<64x32xf32>, vector<8x32xf32> -> vector<8x32xf32>
    %c0_18 = arith.constant 0 : index
    %c0_19 = arith.constant 0 : index
    %110 = vector.load %arg8[%c0_18, %c0_19] : memref<1x32xf32, #tpu.memory_space<vmem>>, vector<1x32xf32>
    %111 = vector.broadcast %110 : vector<1x32xf32> to vector<8x32xf32>
    %112 = arith.addf %109, %111 : vector<8x32xf32>
    %cst_20 = arith.constant 0.000000e+00 : f32
    %113 = vector.broadcast %cst_20 : f32 to vector<8x32xf32>
    %114 = arith.maximumf %112, %113 : vector<8x32xf32>
    %c0_21 = arith.constant 0 : index
    %c0_22 = arith.constant 0 : index
    %115 = vector.load %arg9[%c0_21, %c0_22] : memref<32x128xf32, #tpu.memory_space<vmem>>, vector<32x128xf32>
    %cst_23 = arith.constant dense<0.000000e+00> : vector<8x128xf32>
    %116 = tpu.matmul %114, %115, %cst_23 {dimension_numbers = #tpu.dot_dimension_numbers<[1], [0], [0], [1], [0, 0, 1, 1], [], []>} : vector<8x32xf32>, vector<32x128xf32>, vector<8x128xf32> -> vector<8x128xf32>
    %c0_24 = arith.constant 0 : index
    %c0_25 = arith.constant 0 : index
    %117 = vector.load %arg10[%c0_24, %c0_25] : memref<1x128xf32, #tpu.memory_space<vmem>>, vector<1x128xf32>
    %118 = vector.broadcast %117 : vector<1x128xf32> to vector<8x128xf32>
    %119 = arith.addf %116, %118 : vector<8x128xf32>
    %c0_26 = arith.constant 0 : index
    %c0_27 = arith.constant 0 : index
    %120 = vector.load %arg11[%c0_26, %c0_27] : memref<8x128xf32, #tpu.memory_space<vmem>>, vector<8x128xf32>
    tpu.vector_store %arg11[%c0_26, %c0_27], %119 {strides = array<i32>} : memref<8x128xf32, #tpu.memory_space<vmem>>, vector<8x128xf32>,
    return
  }
  func.func @transform_0(%arg0: i32) -> (i32, i32) {
    %c0_i32 = arith.constant 0 : i32
    %c0_i32_0 = arith.constant 0 : i32
    %c0_i32_1 = arith.constant 0 : i32
    return %c0_i32, %c0_i32_0 : i32, i32
  }
  func.func @transform_1(%arg0: i32) -> (i32, i32) {
    %c0_i32 = arith.constant 0 : i32
    %c0_i32_0 = arith.constant 0 : i32
    %c0_i32_1 = arith.constant 0 : i32
    return %c0_i32, %c0_i32_0 : i32, i32
  }
  func.func @transform_2(%arg0: i32) -> (i32, i32) {
    %c0_i32 = arith.constant 0 : i32
    %c0_i32_0 = arith.constant 0 : i32
    %c0_i32_1 = arith.constant 0 : i32
    return %c0_i32, %c0_i32_0 : i32, i32
  }
  func.func @transform_3(%arg0: i32) -> (i32, i32) {
    %c0_i32 = arith.constant 0 : i32
    %c0_i32_0 = arith.constant 0 : i32
    %c0_i32_1 = arith.constant 0 : i32
    return %c0_i32, %c0_i32_0 : i32, i32
  }
  func.func @transform_4(%arg0: i32) -> (i32, i32) {
    %c0_i32 = arith.constant 0 : i32
    %c0_i32_0 = arith.constant 0 : i32
    %c0_i32_1 = arith.constant 0 : i32
    return %c0_i32, %c0_i32_0 : i32, i32
  }
  func.func @transform_5(%arg0: i32) -> (i32, i32) {
    %c0_i32 = arith.constant 0 : i32
    %c0_i32_0 = arith.constant 0 : i32
    %c0_i32_1 = arith.constant 0 : i32
    return %c0_i32, %c0_i32_0 : i32, i32
  }
  func.func @transform_6(%arg0: i32) -> (i32, i32) {
    %c0_i32 = arith.constant 0 : i32
    %c0_i32_0 = arith.constant 0 : i32
    %c0_i32_1 = arith.constant 0 : i32
    return %c0_i32, %c0_i32_0 : i32, i32
  }
  func.func @transform_7(%arg0: i32) -> (i32, i32) {
    %c0_i32 = arith.constant 0 : i32
    %c0_i32_0 = arith.constant 0 : i32
    %c0_i32_1 = arith.constant 0 : i32
    return %c0_i32, %c0_i32_0 : i32, i32
  }
  func.func @transform_8(%arg0: i32) -> (i32, i32) {
    %c0_i32 = arith.constant 0 : i32
    %c0_i32_0 = arith.constant 0 : i32
    %c0_i32_1 = arith.constant 0 : i32
    return %c0_i32, %c0_i32_0 : i32, i32
  }
  func.func @transform_9(%arg0: i32) -> (i32, i32) {
    %c0_i32 = arith.constant 0 : i32
    %c0_i32_0 = arith.constant 0 : i32
    %c0_i32_1 = arith.constant 0 : i32
    return %c0_i32, %c0_i32_0 : i32, i32
  }
  func.func @transform_10(%arg0: i32) -> (i32, i32) {
    %c0_i32 = arith.constant 0 : i32
    %c0_i32_0 = arith.constant 0 : i32
    %c0_i32_1 = arith.constant 0 : i32
    return %c0_i32, %c0_i32_0 : i32, i32
  }
}

</mosaic_0001>

<bundles_post_ra>
// kernel: network_forward.1
= control target key start
LH: loop header
LB: loop body
LE: loop exit
PB: predicated region body
PF: predicated region fallthrough
CT: control target
= control target key end

     0   :  { %15 = vsyncpa [#allocation3], 0  ;;  %s546_s16 = smov [#allocation2]   ;;  %s547_s18 = smov 128   ;;  %s852_s0 = inlined_call_operand.vmem [shape: s32[8,11], index: 0, kind: input, shape index: {}]   ;;  %s853_s1 = inlined_call_operand.vmem [shape: s32[1,11], index: 1, kind: input, shape index: {}]   ;;  %s854_s2 = inlined_call_operand.hbm [shape: f32[384,128], index: 2, kind: input, shape index: {}]   ;;  %s855_s3 = inlined_call_operand.vmem [shape: f32[1,128], index: 3, kind: input, shape index: {}]   ;;  %s856_s4 = inlined_call_operand.vmem [shape: f32[128,64], index: 4, kind: input, shape index: {}]   ;;  %s857_s5 = inlined_call_operand.vmem [shape: f32[1,64], index: 5, kind: input, shape index: {}]   ;;  %s858_s6 = inlined_call_operand.vmem [shape: f32[64,32], index: 6, kind: input, shape index: {}]   ;;  %s859_s7 = inlined_call_operand.vmem [shape: f32[1,32], index: 7, kind: input, shape index: {}]   ;;  %s860_s8 = inlined_call_operand.vmem [shape: f32[32,128], index: 8, kind: input, shape index: {}]   ;;  %s861_s9 = inlined_call_operand.vmem [shape: f32[1,128], index: 9, kind: input, shape index: {}]   ;;  %s862_s10 = inlined_call_operand.vmem [shape: f32[8,128], index: 10, kind: output, shape index: {}]  }
   0x1   :  { %s24_s15 = sshll.u32 %s854_s2, 4  ;;  %s26_s17 = sshll.u32 %s546_s16, 4  ;;  %s25_s15 = int_to_ptr.hbm [resolvable:$true] %s24_s15  ;;  %s27_s17 = int_to_ptr.vmem [resolvable:$true] %s26_s17 }
   0x2   :  { %s548_s19 = smov 8  }
   0x3   :  { %32 = dma.hbm_to_vmem [thread:$0]  %s25_s15, 6144, %s27_s17, [#allocation3], %s547_s18, %s547_s18, %s548_s19  }
   0x4   :  { %544 = dma.done.wait [#allocation3], 6144  }
   0x5   :  { %545 = vsyncadd [#allocation3], 4294961152  ;;  %v549_v0 = vmov 2   ;;  %v550_v1 = vmov 0   ;;  %v551_v2 = vmov 4   ;;  %v51_v3 = vld [vmem:[%s852_s0] sm:$0xff]  ;;  %v55_v51 = vlaneseq }
   0x6   :  { %505 = vset.pattern.permute.xlu1 %v549_v0  ;;  %503 = vset.pattern.permute.xlu0 %v550_v1  ;;  %v515_v4 = vld [vmem:[%s853_s1] ss:$0 sm:$0xff]  ;;  %v552_v6 = vmov 3   ;;  %v553_v7 = vmov 1   ;;  %v554_v8 = vmov 5   ;;  %v555_v9 = vmov 6  }
   0x7   :  { %507 = vset.pattern.permute.xlu2 %v551_v2  ;;  %v54_v5 = vadd.s32 %v515_v4, %v51_v3  ;;  %v556_v10 = vmov 8   ;;  %v557_v11 = vmov 7   ;;  %v558_v12 = vmov 9   ;;  %v239_v14 = vld [vmem:[#allocation2 + $0x78] sm:$0xff]  ;;  %v238_v17 = vld [vmem:[#allocation2 + $0x70] sm:$0xff]  ;;  %v237_v20 = vld [vmem:[#allocation2 + $0x68] sm:$0xff] }
   0x8   :  { %v559_v13 = vmov 10   ;;  %v255_v15 = vld [vmem:[#allocation2 + $0xf8] sm:$0xff]  ;;  %276 = vmatpush.msra.mxu0 %v239_v14  ;;  %v254_v18 = vld [vmem:[#allocation2 + $0xf0] sm:$0xff]  ;;  %v253_v21 = vld [vmem:[#allocation2 + $0xe8] sm:$0xff]  ;;  %v627_v59 = vand.u32 127, %v55_v51 }
   0x9   :  { %90 = vperm.xlu1 %505, %v54_v5   ;;  %60 = vperm.xlu0 %503, %v54_v5   ;;  %v271_v16 = vld [vmem:[#allocation2 + $0x178] sm:$0xff]  ;;  %v270_v19 = vld [vmem:[#allocation2 + $0x170] sm:$0xff]  ;;  %v269_v22 = vld [vmem:[#allocation2 + $0x168] sm:$0xff] }
   0xa   :  { %120 = vperm.xlu2 %507, %v54_v5   ;;  %296 = vmatpush.msra.mxu1 %v255_v15  ;;  %v236_v23 = vld [vmem:[#allocation2 + $0x60] sm:$0xff]  ;;  %v235_v26 = vld [vmem:[#allocation2 + $0x58] sm:$0xff]  ;;  %v234_v29 = vld [vmem:[#allocation2 + $0x50] sm:$0xff]  ;;  %v634_v4 = vadd.s32 128, %v627_v59 }
   0xb   :  { %316 = vmatpush.msra.mxu2 %v271_v16  ;;  %277 = vmatpush.msra.mxu0 %v238_v17  ;;  %v252_v24 = vld [vmem:[#allocation2 + $0xe0] sm:$0xff]  ;;  %v251_v27 = vld [vmem:[#allocation2 + $0xd8] sm:$0xff]  ;;  %v250_v30 = vld [vmem:[#allocation2 + $0xd0] sm:$0xff] }
   0xc   :  { %297 = vmatpush.msra.mxu1 %v254_v18  ;;  %v268_v25 = vld [vmem:[#allocation2 + $0x160] sm:$0xff]  ;;  %v267_v28 = vld [vmem:[#allocation2 + $0x158] sm:$0xff]  ;;  %v266_v31 = vld [vmem:[#allocation2 + $0x150] sm:$0xff] }
   0xd   :  { %317 = vmatpush.msra.mxu2 %v270_v19  ;;  %278 = vmatpush.msra.mxu0 %v237_v20  ;;  %v233_v32 = vld [vmem:[#allocation2 + $0x48] sm:$0xff]  ;;  %v232_v35 = vld [vmem:[#allocation2 + $0x40] sm:$0xff]  ;;  %v231_v38 = vld [vmem:[#allocation2 + $0x38] sm:$0xff] }
   0xe   :  { %298 = vmatpush.msra.mxu1 %v253_v21  ;;  %v249_v33 = vld [vmem:[#allocation2 + $0xc8] sm:$0xff]  ;;  %v248_v36 = vld [vmem:[#allocation2 + $0xc0] sm:$0xff]  ;;  %v247_v39 = vld [vmem:[#allocation2 + $0xb8] sm:$0xff] }
   0xf   :  { %318 = vmatpush.msra.mxu2 %v269_v22  ;;  %279 = vmatpush.msra.mxu0 %v236_v23  ;;  %v265_v34 = vld [vmem:[#allocation2 + $0x148] sm:$0xff]  ;;  %v264_v37 = vld [vmem:[#allocation2 + $0x140] sm:$0xff]  ;;  %v263_v40 = vld [vmem:[#allocation2 + $0x138] sm:$0xff] }
  0x10   :  { %299 = vmatpush.msra.mxu1 %v252_v24  ;;  %v230_v42 = vld [vmem:[#allocation2 + $0x30] sm:$0xff]  ;;  %v229_v45 = vld [vmem:[#allocation2 + $0x28] sm:$0xff]  ;;  %v228_v48 = vld [vmem:[#allocation2 + $0x20] sm:$0xff] }
  0x11   :  { %506 = vset.pattern.permute.xlu1 %v552_v6  ;;  %504 = vset.pattern.permute.xlu0 %v553_v7  ;;  %v246_v43 = vld [vmem:[#allocation2 + $0xb0] sm:$0xff]  ;;  %v245_v46 = vld [vmem:[#allocation2 + $0xa8] sm:$0xff]  ;;  %v244_v49 = vld [vmem:[#allocation2 + $0xa0] sm:$0xff]  ;;  %v640_v6 = vadd.s32 256, %v627_v59 }
  0x12   :  { %105 = vperm.xlu1 %506, %v54_v5   ;;  %75 = vperm.xlu0 %504, %v54_v5   ;;  %v262_v44 = vld [vmem:[#allocation2 + $0x130] sm:$0xff]  ;;  %v261_v47 = vld [vmem:[#allocation2 + $0x128] sm:$0xff]  ;;  %v260_v50 = vld [vmem:[#allocation2 + $0x120] sm:$0xff] }
  0x13   :  { %508 = vset.pattern.permute.xlu2 %v554_v8  ;;  %319 = vmatpush.msra.mxu2 %v268_v25  ;;  %v227_v52 = vld [vmem:[#allocation2 + $0x18] sm:$0xff]  ;;  %v226_v55 = vld [vmem:[#allocation2 + $0x10] sm:$0xff]  ;;  %v225_v58 = vld [vmem:[#allocation2 + $0x8] sm:$0xff] }
  0x14   :  { %135 = vperm.xlu2 %508, %v54_v5   ;;  %280 = vmatpush.msra.mxu0 %v235_v26  ;;  %v243_v53 = vld [vmem:[#allocation2 + $0x98] sm:$0xff]  ;;  %v242_v56 = vld [vmem:[#allocation2 + $0x90] sm:$0xff]  ;;  %v241_v61 = vld [vmem:[#allocation2 + $0x88] sm:$0xff] }
  0x15   :  { %300 = vmatpush.msra.mxu1 %v251_v27  ;;  %320 = vmatpush.msra.mxu2 %v267_v28  ;;  %v259_v54 = vld [vmem:[#allocation2 + $0x118] sm:$0xff]  ;;  %v258_v57 = vld [vmem:[#allocation2 + $0x110] sm:$0xff]  ;;  %v257_v62 = vld [vmem:[#allocation2 + $0x108] sm:$0xff] }
  0x16   :  { %281 = vmatpush.msra.mxu0 %v234_v29  ;;  %v224_v1 = vld [vmem:[#allocation2] sm:$0xff]  ;;  %v351_v7 = vld [vmem:[%s856_s4 + $0x70] sm:$0xff]  ;;  %v350_v8 = vld [vmem:[%s856_s4 + $0x68] sm:$0xff] }
  0x17   :  { %301 = vmatpush.msra.mxu1 %v250_v30  ;;  %321 = vmatpush.msra.mxu2 %v266_v31  ;;  %v240_v2 = vld [vmem:[#allocation2 + $0x80] sm:$0xff]  ;;  %v348_v18 = vld [vmem:[%s856_s4 + $0x58] sm:$0xff]  ;;  %v347_v24 = vld [vmem:[%s856_s4 + $0x50] sm:$0xff] }
  0x18   :  { %282 = vmatpush.msra.mxu0 %v233_v32  ;;  %v256_v3 = vld [vmem:[#allocation2 + $0x100] sm:$0xff]  ;;  %v346_v31 = vld [vmem:[%s856_s4 + $0x48] sm:$0xff] }
  0x19   :  { %302 = vmatpush.msra.mxu1 %v249_v33  ;;  %322 = vmatpush.msra.mxu2 %v265_v34 }
  0x1a   :  { %509 = vset.pattern.permute.xlu1 %v555_v9  ;;  %511 = vset.pattern.permute.xlu0 %v556_v10  ;;  %v560_v9 = vmov 0.0  }
  0x1b   :  { %150 = vperm.xlu1 %509, %v54_v5   ;;  %180 = vperm.xlu0 %511, %v54_v5  }
  0x1c   :  { %510 = vset.pattern.permute.xlu2 %v557_v11  ;;  %283 = vmatpush.msra.mxu0 %v232_v35 }
  0x1d   :  { %165 = vperm.xlu2 %510, %v54_v5   ;;  %303 = vmatpush.msra.mxu1 %v248_v36 }
  0x1e   :  { %323 = vmatpush.msra.mxu2 %v264_v37  ;;  %284 = vmatpush.msra.mxu0 %v231_v38 }
  0x1f   :  { %304 = vmatpush.msra.mxu1 %v247_v39  ;;  %v345_v39 = vld [vmem:[%s856_s4 + $0x40] sm:$0xff] }
  0x20   :  { %324 = vmatpush.msra.mxu2 %v263_v40  ;;  %285 = vmatpush.msra.mxu0 %v230_v42 }
  0x21   :  { %305 = vmatpush.msra.mxu1 %v246_v43 }
  0x22   :  { %325 = vmatpush.msra.mxu2 %v262_v44  ;;  %286 = vmatpush.msra.mxu0 %v229_v45 }
  0x23   :  { %512 = vset.pattern.permute.xlu1 %v558_v12  ;;  %514 = vset.pattern.permute.xlu0 %v559_v13  ;;  %v349_v12 = vld [vmem:[%s856_s4 + $0x60] sm:$0xff] }
  0x24   :  { %195 = vperm.xlu1 %512, %v54_v5   ;;  %306 = vmatpush.msra.mxu1 %v245_v46 }
  0x25   :  { %513 = vset.pattern.permute.xlu2 %v559_v13  ;;  %326 = vmatpush.msra.mxu2 %v261_v47 }
  0x26   :  { %210 = vperm.xlu2 %513, %v54_v5   ;;  %287 = vmatpush.msra.mxu0 %v228_v48  ;;  %v352_v5 = vld [vmem:[%s856_s4 + $0x78] sm:$0xff] }
  0x27   :  { %307 = vmatpush.msra.mxu1 %v244_v49  ;;  %327 = vmatpush.msra.mxu2 %v260_v50  ;;  %v344_v48 = vld [vmem:[%s856_s4 + $0x38] sm:$0xff] }
  0x28   :  { %288 = vmatpush.msra.mxu0 %v227_v52  ;;  %357 = vmatpush.msra.mxu3 %v352_v5 }
  0x29   :  { %308 = vmatpush.msra.mxu1 %v243_v53  ;;  %328 = vmatpush.msra.mxu2 %v259_v54 }
  0x2a   :  { %289 = vmatpush.msra.mxu0 %v226_v55  ;;  %358 = vmatpush.msra.mxu3 %v351_v7  ;;  %v343_v55 = vld [vmem:[%s856_s4 + $0x30] sm:$0xff] }
  0x2b   :  { %309 = vmatpush.msra.mxu1 %v242_v56  ;;  %329 = vmatpush.msra.mxu2 %v258_v57 }
  0x2c   :  { %290 = vmatpush.msra.mxu0 %v225_v58  ;;  %359 = vmatpush.msra.mxu3 %v350_v8 }
  0x2d   :  { %310 = vmatpush.msra.mxu1 %v241_v61  ;;  %330 = vmatpush.msra.mxu2 %v257_v62 }
  0x2e   :  { %291 = vmatpush.msra.mxu0 %v224_v1  ;;  %360 = vmatpush.msra.mxu3 %v349_v12 }
  0x2f   :  { %311 = vmatpush.msra.mxu1 %v240_v2  ;;  %331 = vmatpush.msra.mxu2 %v256_v3 }
  0x30   :  { %361 = vmatpush.msra.mxu3 %v348_v18 }
  0x32   :  { %362 = vmatpush.msra.mxu3 %v347_v24 }
  0x34   :  { %363 = vmatpush.msra.mxu3 %v346_v31  ;;  %v383_v31 = vld [vmem:[%s858_s6 + $0x28] sm:$0xff] }
  0x36   :  { %364 = vmatpush.msra.mxu3 %v345_v39 }
  0x38   :  { %365 = vmatpush.msra.mxu3 %v344_v48 }
  0x3a   :  { %366 = vmatpush.msra.mxu3 %v343_v55 }
  0x64   :  { %v625_v41 = vpop.permute.xlu2 %120 }
  0x65   :  { %vm122_vm0 = vcmp.eq.s32.totalorder %v627_v59, %v625_v41  ;;  %vm123_vm1 = vcmp.eq.s32.totalorder %v634_v4, %v625_v41  ;;  %vm124_vm2 = vcmp.eq.s32.totalorder %v640_v6, %v625_v41 }
  0x66   :  { %v465_v10 = vsel %vm122_vm0, 1.0, %v560_v9  ;;  %v466_v11 = vsel %vm123_vm1, 1.0, %v560_v9  ;;  %v467_v13 = vsel %vm124_vm2, 1.0, %v560_v9 }
  0x6e   :  { %v629_v60 = vpop.permute.xlu2 %135 }
  0x6f   :  { %vm137_vm3 = vcmp.eq.s32.totalorder %v627_v59, %v629_v60  ;;  %vm138_vm7 = vcmp.eq.s32.totalorder %v634_v4, %v629_v60  ;;  %vm139_vm8 = vcmp.eq.s32.totalorder %v640_v6, %v629_v60 }
  0x70   :  { %v468_v16 = vsel %vm137_vm3, 1.0, %v560_v9  ;;  %v469_v38 = vsel %vm138_vm7, 1.0, %v560_v9  ;;  %v470_v43 = vsel %vm139_vm8, 1.0, %v560_v9 }
  0x77   :  { %v677_v17 = vpop.permute.xlu2 %165 }
  0x78   :  { %vm167_vm2 = vcmp.eq.s32.totalorder %v627_v59, %v677_v17  ;;  %vm168_vm3 = vcmp.eq.s32.totalorder %v634_v4, %v677_v17 }
  0x79   :  { %v474_v46 = vsel %vm167_vm2, 1.0, %v560_v9  ;;  %v475_v61 = vsel %vm168_vm3, 1.0, %v560_v9  ;;  %vm423_vm2 = vcmask 261120  }
  0x7b   :  { %v631_v63 = vpop.permute.xlu1 %90  ;;  %v61_v0 = vpop.permute.xlu0 %60 }
  0x7c   :  { %vm62_vm4 = vcmp.eq.s32.totalorder %v627_v59, %v61_v0  ;;  %vm63_vm5 = vcmp.eq.s32.totalorder %v634_v4, %v61_v0  ;;  %vm64_vm6 = vcmp.eq.s32.totalorder %v640_v6, %v61_v0  ;;  %vm92_vm9 = vcmp.eq.s32.totalorder %v627_v59, %v631_v63 }
  0x7d   :  { %vm93_vm10 = vcmp.eq.s32.totalorder %v634_v4, %v631_v63  ;;  %vm94_vm11 = vcmp.eq.s32.totalorder %v640_v6, %v631_v63  ;;  %v453_v19 = vsel %vm62_vm4, 1.0, %v560_v9  ;;  %v454_v20 = vsel %vm63_vm5, 1.0, %v560_v9 }
  0x7e   :  { %v455_v21 = vsel %vm64_vm6, 1.0, %v560_v9  ;;  %v459_v28 = vsel %vm92_vm9, 1.0, %v560_v9  ;;  %v460_v29 = vsel %vm93_vm10, 1.0, %v560_v9  ;;  %v461_v32 = vsel %vm94_vm11, 1.0, %v560_v9 }
  0x7f   :  { %vm169_vm4 = vcmp.eq.s32.totalorder %v640_v6, %v677_v17 }
  0x80   :  { %v211_v54 = vpop.permute.xlu2 %210  ;;  %v476_v0 = vsel %vm169_vm4, 1.0, %v560_v9 }
  0x81   :  { %vm212_vm11 = vcmp.eq.s32.totalorder %v627_v59, %v211_v54 }
  0x84   :  { %v106_v14 = vpop.permute.xlu1 %105  ;;  %v76_v15 = vpop.permute.xlu0 %75 }
  0x85   :  { %vm77_vm12 = vcmp.eq.s32.totalorder %v627_v59, %v76_v15  ;;  %vm78_vm13 = vcmp.eq.s32.totalorder %v634_v4, %v76_v15  ;;  %vm107_vm14 = vcmp.eq.s32.totalorder %v627_v59, %v106_v14  ;;  %vm79_vm15 = vcmp.eq.s32.totalorder %v640_v6, %v76_v15 }
  0x86   :  { %v456_v22 = vsel %vm77_vm12, 1.0, %v560_v9  ;;  %v457_v23 = vsel %vm78_vm13, 1.0, %v560_v9  ;;  %vm108_vm0 = vcmp.eq.s32.totalorder %v634_v4, %v106_v14  ;;  %v458_v25 = vsel %vm79_vm15, 1.0, %v560_v9 }
  0x87   :  { %v86_v26 = vadd.f32 %v456_v22, %v453_v19  ;;  %v87_v27 = vadd.f32 %v457_v23, %v454_v20  ;;  %vm109_vm1 = vcmp.eq.s32.totalorder %v640_v6, %v106_v14  ;;  %v88_v30 = vadd.f32 %v458_v25, %v455_v21 }
  0x88   :  { %v462_v35 = vsel %vm107_vm14, 1.0, %v560_v9  ;;  %v463_v36 = vsel %vm108_vm0, 1.0, %v560_v9  ;;  %v464_v40 = vsel %vm109_vm1, 1.0, %v560_v9  ;;  %vm213_vm12 = vcmp.eq.s32.totalorder %v634_v4, %v211_v54 }
  0x89   :  { %v101_v33 = vadd.f32 %v459_v28, %v86_v26  ;;  %v102_v34 = vadd.f32 %v460_v29, %v87_v27  ;;  %v103_v37 = vadd.f32 %v461_v32, %v88_v30  ;;  %vm214_vm13 = vcmp.eq.s32.totalorder %v640_v6, %v211_v54  ;;  %v338_v27 = vld [vmem:[%s856_s4 + $0x8] sm:$0xff]  ;;  %v337_v28 = vld [vmem:[%s856_s4] sm:$0xff]  ;;  %v385_v29 = vld [vmem:[%s858_s6 + $0x38] sm:$0xff] }
  0x8a   :  { %v483_v14 = vsel %vm212_vm11, 1.0, %v560_v9  ;;  %v484_v15 = vsel %vm213_vm12, 1.0, %v560_v9  ;;  %v485_v20 = vsel %vm214_vm13, 1.0, %v560_v9  ;;  %v384_v30 = vld [vmem:[%s858_s6 + $0x30] sm:$0xff]  ;;  %402 = vmatpush.msrb.mxu0 %v385_v29  ;;  %v382_v32 = vld [vmem:[%s858_s6 + $0x20] sm:$0xff]  ;;  %vm390_vm1 = vcmask 523264  }
  0x8b   :  { %v116_v41 = vadd.f32 %v462_v35, %v101_v33  ;;  %v117_v42 = vadd.f32 %v463_v36, %v102_v34  ;;  %v118_v44 = vadd.f32 %v464_v40, %v103_v37  ;;  %v381_v33 = vld [vmem:[%s858_s6 + $0x18] sm:$0xff]  ;;  %v516_v34 = vld [vmem:[%s855_s3] ss:$0 sm:$0xff] }
  0x8c   :  { %403 = vmatpush.msrb.mxu0 %v384_v30 }
  0x8d   :  { %v151_v45 = vpop.permute.xlu1 %150  ;;  %v181_v47 = vpop.permute.xlu0 %180  ;;  %v131_v49 = vadd.f32 %v465_v10, %v116_v41  ;;  %v132_v50 = vadd.f32 %v466_v11, %v117_v42  ;;  %v133_v51 = vadd.f32 %v467_v13, %v118_v44  ;;  %v380_v42 = vld [vmem:[%s858_s6 + $0x10] sm:$0xff]  ;;  %v378_v44 = vld [vmem:[%s858_s6] sm:$0xff] }
  0x8e   :  { %vm152_vm5 = vcmp.eq.s32.totalorder %v627_v59, %v151_v45  ;;  %vm153_vm6 = vcmp.eq.s32.totalorder %v634_v4, %v151_v45  ;;  %vm154_vm7 = vcmp.eq.s32.totalorder %v640_v6, %v151_v45  ;;  %vm182_vm8 = vcmp.eq.s32.totalorder %v627_v59, %v181_v47  ;;  %404 = vmatpush.msrb.mxu0 %v383_v31  ;;  %v418_v45 = vld [vmem:[%s860_s8 + $0x18] sm:$0xff] }
  0x8f   :  { %v471_v52 = vsel %vm152_vm5, 1.0, %v560_v9  ;;  %v472_v53 = vsel %vm153_vm6, 1.0, %v560_v9  ;;  %v146_v56 = vadd.f32 %v468_v16, %v131_v49  ;;  %v147_v57 = vadd.f32 %v469_v38, %v132_v50  ;;  %439 = vmatpush.msrb.mxu1 %v418_v45 }
  0x90   :  { %v473_v58 = vsel %vm154_vm7, 1.0, %v560_v9  ;;  %v148_v60 = vadd.f32 %v470_v43, %v133_v51  ;;  %vm183_vm9 = vcmp.eq.s32.totalorder %v634_v4, %v181_v47  ;;  %vm184_vm10 = vcmp.eq.s32.totalorder %v640_v6, %v181_v47  ;;  %405 = vmatpush.msrb.mxu0 %v382_v32  ;;  %v379_v43 = vld [vmem:[%s858_s6 + $0x8] sm:$0xff]  ;;  %v517_v47 = vld [vmem:[%s857_s5] ss:$0 sm:$0xff] }
  0x91   :  { %v161_v62 = vadd.f32 %v471_v52, %v146_v56  ;;  %v162_v63 = vadd.f32 %v472_v53, %v147_v57  ;;  %v477_v2 = vsel %vm182_vm8, 1.0, %v560_v9  ;;  %v478_v3 = vsel %vm183_vm9, 1.0, %v560_v9  ;;  %v416_v51 = vld [vmem:[%s860_s8 + $0x8] sm:$0xff]  ;;  %v415_v52 = vld [vmem:[%s860_s8] sm:$0xff] }
  0x92   :  { %v163_v1 = vadd.f32 %v473_v58, %v148_v60  ;;  %v479_v8 = vsel %vm184_vm10, 1.0, %v560_v9  ;;  %406 = vmatpush.msrb.mxu0 %v381_v33  ;;  %v518_v53 = vld [vmem:[%s859_s7] ss:$0 sm:$0xff] }
  0x93   :  { %v176_v5 = vadd.f32 %v474_v46, %v161_v62  ;;  %v177_v7 = vadd.f32 %v475_v61, %v162_v63  ;;  %v417_v46 = vld [vmem:[%s860_s8 + $0x10] sm:$0xff]  ;;  %v519_v57 = vld [vmem:[%s861_s9] ss:$0 sm:$0xff] }
  0x94   :  { %v178_v10 = vadd.f32 %v476_v0, %v163_v1  ;;  %407 = vmatpush.msrb.mxu0 %v380_v42  ;;  %440 = vmatpush.msrb.mxu1 %v417_v46 }
  0x95   :  { %v191_v11 = vadd.f32 %v477_v2, %v176_v5  ;;  %v192_v12 = vadd.f32 %v478_v3, %v177_v7 }
  0x96   :  { %v196_v13 = vpop.permute.xlu1 %195  ;;  %v193_v16 = vadd.f32 %v479_v8, %v178_v10  ;;  %408 = vmatpush.msrb.mxu0 %v379_v43  ;;  %441 = vmatpush.msrb.mxu1 %v416_v51 }
  0x97   :  { %vm197_vm14 = vcmp.eq.s32.totalorder %v627_v59, %v196_v13  ;;  %vm198_vm15 = vcmp.eq.s32.totalorder %v634_v4, %v196_v13  ;;  %vm199_vm0 = vcmp.eq.s32.totalorder %v640_v6, %v196_v13  ;;  %v342_v59 = vld [vmem:[%s856_s4 + $0x28] sm:$0xff]  ;;  %v341_v4 = vld [vmem:[%s856_s4 + $0x20] sm:$0xff]  ;;  %v340_v6 = vld [vmem:[%s856_s4 + $0x18] sm:$0xff] }
  0x98   :  { %v480_v17 = vsel %vm197_vm14, 1.0, %v560_v9  ;;  %v481_v18 = vsel %vm198_vm15, 1.0, %v560_v9  ;;  %v482_v19 = vsel %vm199_vm0, 1.0, %v560_v9  ;;  %367 = vmatpush.msra.mxu3 %v342_v59  ;;  %v339_v9 = vld [vmem:[%s856_s4 + $0x10] sm:$0xff]  ;;  %409 = vmatpush.msrb.mxu0 %v378_v44 }
  0x99   :  { %v206_v21 = vadd.f32 %v480_v17, %v191_v11  ;;  %v207_v22 = vadd.f32 %v481_v18, %v192_v12  ;;  %v208_v23 = vadd.f32 %v482_v19, %v193_v16  ;;  %442 = vmatpush.msrb.mxu1 %v415_v52 }
  0x9a   :  { %368 = vmatpush.msra.mxu3 %v341_v4 }
  0x9b   :  { %v221_v24 = vadd.f32 %v483_v14, %v206_v21  ;;  %v222_v25 = vadd.f32 %v484_v15, %v207_v22  ;;  %v223_v26 = vadd.f32 %v485_v20, %v208_v23 }
  0x9c   :  { %369 = vmatpush.msra.mxu3 %v340_v6 }
  0x9d   :  { %292 = vmatmul.f32.vlgmr.msra.gmra.mxu0 %v221_v24  ;;  %312 = vmatmul.f32.vlgmr.msra.gmra.mxu1 %v222_v25 }
  0x9e   :  { %332 = vmatmul.f32.vlgmr.msra.gmra.mxu2 %v223_v26  ;;  %370 = vmatpush.msra.mxu3 %v339_v9 }
  0xa0   :  { %371 = vmatpush.msra.mxu3 %v338_v27 }
  0xa2   :  { %372 = vmatpush.msra.mxu3 %v337_v28 }
 0x11a   :  { %v293_v35 = vpop.f32.mrf.mxu0  ;;  %v313_v37 = vpop.f32.mrf.mxu1 }
 0x11b   :  { %v294_v36 = vadd.f32 %v516_v34, %v293_v35 }
 0x11d   :  { %v314_v38 = vadd.f32 %v313_v37, %v294_v36 }
 0x121   :  { %v333_v39 = vpop.f32.mrf.mxu2 }
 0x122   :  { %v334_v40 = vadd.f32 %v333_v39, %v314_v38 }
 0x124   :  { %v336_v41 = vmax.f32 %v334_v40, 0.0 }
 0x126   :  { %373 = vmatmul.f32.vlgmr.msra.gmra.mxu3 %v336_v41 }
 0x1a9   :  { %v374_v48 = vpop.f32.mrf.mxu3 }
 0x1aa   :  { %v375_v49 = vadd.f32 %v517_v47, %v374_v48 }
 0x1ac   :  { %v377_v50 = vmax.f32 %v375_v49, 0.0 }
 0x1ae   :  { %486 = vmatmul.msk.f32.vlgmr.msrb.gmra.mxu0 %vm390_vm1, %v377_v50 }
 0x22b   :  { %v411_v54 = vpop.f32.mrf.mxu0 }
 0x22c   :  { %v412_v55 = vadd.f32 %v518_v53, %v411_v54 }
 0x22e   :  { %v414_v56 = vmax.f32 %v412_v55, 0.0 }
 0x230   :  { %487 = vmatmul.msk.f32.vlgmr.msrb.gmra.mxu1 %vm423_vm2, %v414_v56 }
 0x2ad   :  { %v444_v58 = vpop.f32.mrf.mxu1 }
 0x2ae   :  { %v445_v60 = vadd.f32 %v519_v57, %v444_v58 }
 0x2b0   :  { %447 = vst [vmem:[%s862_s10] sm:$0xff] %v445_v60 }
 0x2b1   :  { %452 = vsyncpa [#allocation3], 1 }

</bundles_post_ra>
